<compile_context>
chip_gen: v7x
topology: tpu7x:2x2x1
jax: 0.10.0
libtpu: 0.0.40
codegen_flags: <defaults>
</compile_context>

<pallas_src>
import functools

import jax
import jax.numpy as jnp
from jax import lax
from jax.experimental import pallas as pl
from jax.experimental.pallas import tpu as pltpu


def _ln4dcf_kernel(x_ref, g_ref, b_ref, o_ref, *, eps, inv_n):
    # x_ref / o_ref: (C, TILE_T, F); g_ref / b_ref: (C, 1, F), already f32.
    x = x_ref[...].astype(jnp.float32)

    # Two-stage statistics: VPU adds across C (axis 0), then ONE cross-lane
    # XLU reduce per quantity over F.  Single-pass sum / sum-of-squares in f32.
    t1 = jnp.sum(x, axis=0)                        # (TILE_T, F)   VPU
    t2 = jnp.sum(x * x, axis=0)                    # (TILE_T, F)   VPU
    s = jnp.sum(t1, axis=-1, keepdims=True)        # (TILE_T, 1)   XLU
    ss = jnp.sum(t2, axis=-1, keepdims=True)       # (TILE_T, 1)   XLU

    mu = s * inv_n
    var = jnp.maximum(ss * inv_n - mu * mu, 0.0)   # biased (unbiased=False)
    inv_std = lax.rsqrt(var + eps)                 # EUP rsqrt (own slot)

    g = g_ref[...]                                 # (C, 1, F) f32
    b = b_ref[...]                                 # (C, 1, F) f32
    xn = (x - mu[None, :, :]) * inv_std[None, :, :]
    o_ref[...] = (xn * g + b).astype(o_ref.dtype)


def _sublane_multiple(dtype):
    # Dense packing for the second-to-last block dim: 8 for 32-bit dtypes,
    # 16 for bf16/f16, 32 for int8/fp8.
    return max(8, 32 // jnp.dtype(dtype).itemsize)


def _vmem_budgets():
    """Return (max_block_bytes, vmem_limit_bytes) tuned per TPU generation."""
    vmem_cap = None
    try:
        info = pltpu.get_tpu_info()
        vmem_cap = getattr(info, "vmem_capacity_bytes", None)
    except Exception:
        vmem_cap = None
    if vmem_cap is None:
        vmem_cap = 64 << 20  # unknown -> assume the smallest (v7x-like) VMEM
    if vmem_cap >= (100 << 20):
        # v5e / v6e: 128 MiB VMEM -> bigger blocks, fewer ~0.35us grid steps.
        return 4 << 20, 64 << 20
    # v7x: 64 MiB per TC.  Per-step footprint ~ 4x block (double-buffered
    # in/out) + ~3 f32 temporaries -> cap blocks at 2 MiB, leave headroom.
    return 2 << 20, 36 << 20


def _choose_tile_t(T, C, F, dtype, max_block_bytes):
    """Largest sublane-dense T tile whose f32 block stays under budget.

    Does NOT require tile_t to divide T (the grid uses cdiv and ragged last
    blocks are safe for this per-row reduction)."""
    sub = _sublane_multiple(dtype)
    row_bytes = C * F * 4  # in-kernel temporaries are f32 regardless of input
    max_t = max_block_bytes // row_bytes
    # At least one sublane group even when a single (C, F) row exceeds the
    # budget (raised-budget fallback replaces the old full-T fallback).
    tile = max(sub, (max_t // sub) * sub)
    return min(tile, T)  # full extent (== T) is always a legal block dim


def layer_normalization_4d_cf(x, gamma, beta, eps=1e-5):
    """x: [B, C, T, F]; gamma/beta: [1, C, 1, F]. Returns [B, C, T, F]."""
    B, C, T, F = x.shape
    # Grid-invariant params: reshape + pre-cast once in the wrapper.
    g3 = gamma.reshape(C, 1, F).astype(jnp.float32)
    b3 = beta.reshape(C, 1, F).astype(jnp.float32)

    max_block_bytes, vmem_limit = _vmem_budgets()
    tile_t = _choose_tile_t(T, C, F, x.dtype, max_block_bytes)
    sub = _sublane_multiple(x.dtype)

    # Megacore balancing (v7x has 2 TCs): make sure the "parallel" grid has at
    # least 2 total steps; shrink tile_t (keeping it sublane-dense) if needed.
    num_t = pl.cdiv(T, tile_t)
    while B * num_t < 2 and tile_t > sub:
        tile_t = max(sub, ((tile_t // 2) // sub) * sub)
        num_t = pl.cdiv(T, tile_t)

    grid = (B, num_t)
    inv_n = 1.0 / float(C * F)

    return pl.pallas_call(
        functools.partial(_ln4dcf_kernel, eps=float(eps), inv_n=inv_n),
        out_shape=jax.ShapeDtypeStruct((B, C, T, F), x.dtype),
        grid_spec=pltpu.PrefetchScalarGridSpec(
            num_scalar_prefetch=0,
            grid=grid,
            in_specs=[
                # Native NCHW tile: one batch (squeezed), full C, a T tile,
                # full F.  No wrapper transposes.
                pl.BlockSpec((pl.Squeezed(), C, tile_t, F),
                             lambda bi, ti: (bi, 0, ti, 0)),
                pl.BlockSpec((C, 1, F), lambda bi, ti: (0, 0, 0)),
                pl.BlockSpec((C, 1, F), lambda bi, ti: (0, 0, 0)),
            ],
            out_specs=pl.BlockSpec((pl.Squeezed(), C, tile_t, F),
                                   lambda bi, ti: (bi, 0, ti, 0)),
        ),
        compiler_params=pltpu.CompilerParams(
            # Both axes independent -> v7x megacore shards the grid; harmless
            # on single-TC v5e/v6e.
            dimension_semantics=("parallel", "parallel"),
            vmem_limit_bytes=vmem_limit,
        ),
    )(x, g3, b3)


def _reference(x, gamma, beta, eps=1e-5):
    mu = jnp.mean(x, axis=(1, 3), keepdims=True)
    var = jnp.var(x, axis=(1, 3), keepdims=True)  # biased
    return (x - mu) / jnp.sqrt(var + eps) * gamma + beta


if __name__ == "__main__":
    key = jax.random.PRNGKey(0)
    B, C, T, F = 2, 4, 16, 32

    x = jax.random.normal(key, (B, C, T, F), dtype=jnp.float32)
    # Deterministic parameter init matching the module's __init__:
    gamma = jnp.ones((1, C, 1, F), dtype=jnp.float32)   # init.ones_
    beta = jnp.zeros((1, C, 1, F), dtype=jnp.float32)   # init.zeros_

    out = layer_normalization_4d_cf(x, gamma, beta, eps=1e-5)
    out = jax.block_until_ready(out)

    ref = _reference(x, gamma, beta, eps=1e-5)
    assert out.shape == (B, C, T, F)
    assert jnp.allclose(out, ref, atol=1e-5, rtol=1e-5), "mismatch vs reference"

    print("KERNEL_OK")
</pallas_src>

<mosaic_0001>
module attributes {stable_mosaic.version = 11 : i64} {
  func.func @_ln4dcf_kernel(%arg0: i32, %arg1: i32, %arg2: memref<1x4x16x32xf32, #tpu.memory_space<vmem>>, %arg3: memref<4x1x32xf32, #tpu.memory_space<vmem>>, %arg4: memref<4x1x32xf32, #tpu.memory_space<vmem>>, %arg5: memref<1x4x16x32xf32, #tpu.memory_space<vmem>>) attributes {dimension_semantics = [#tpu.dimension_semantics<parallel>, #tpu.dimension_semantics<parallel>], iteration_bounds = array<i64: 2, 1>, scalar_prefetch = 0 : i64, scratch_operands = 0 : i64, tpu.core_type = #tpu.core_type<tc>, window_params = [{transform_indices = @transform_0, window_bounds = array<i64: 1, 4, 16, 32>}, {pipeline_mode = #tpu.pipeline_mode<synchronous>, transform_indices = @transform_1, window_bounds = array<i64: 4, 1, 32>}, {pipeline_mode = #tpu.pipeline_mode<synchronous>, transform_indices = @transform_2, window_bounds = array<i64: 4, 1, 32>}, {transform_indices = @transform_3, window_bounds = array<i64: 1, 4, 16, 32>}]} {
    %c0 = arith.constant 0 : index
    %c0_0 = arith.constant 0 : index
    %c0_1 = arith.constant 0 : index
    %c0_2 = arith.constant 0 : index
    %0 = vector.load %arg2[%c0, %c0_0, %c0_1, %c0_2] : memref<1x4x16x32xf32, #tpu.memory_space<vmem>>, vector<1x4x16x32xf32>
    %1 = vector.shape_cast %0 : vector<1x4x16x32xf32> to vector<4x16x32xf32>
    %cst = arith.constant dense<0.000000e+00> : vector<16x32xf32>
    %2 = vector.multi_reduction <add>, %1, %cst [0] : vector<4x16x32xf32> to vector<16x32xf32>
    %3 = arith.mulf %1, %1 : vector<4x16x32xf32>
    %cst_3 = arith.constant dense<0.000000e+00> : vector<16x32xf32>
    %4 = vector.multi_reduction <add>, %3, %cst_3 [0] : vector<4x16x32xf32> to vector<16x32xf32>
    %cst_4 = arith.constant dense<0.000000e+00> : vector<16xf32>
    %5 = vector.multi_reduction <add>, %2, %cst_4 [1] : vector<16x32xf32> to vector<16xf32>
    %6 = vector.shape_cast %5 : vector<16xf32> to vector<16x1xf32>
    %cst_5 = arith.constant dense<0.000000e+00> : vector<16xf32>
    %7 = vector.multi_reduction <add>, %4, %cst_5 [1] : vector<16x32xf32> to vector<16xf32>
    %8 = vector.shape_cast %7 : vector<16xf32> to vector<16x1xf32>
    %cst_6 = arith.constant 7.812500e-03 : f32
    %9 = vector.broadcast %cst_6 : f32 to vector<16x1xf32>
    %10 = arith.mulf %6, %9 : vector<16x1xf32>
    %cst_7 = arith.constant 7.812500e-03 : f32
    %11 = vector.broadcast %cst_7 : f32 to vector<16x1xf32>
    %12 = arith.mulf %8, %11 : vector<16x1xf32>
    %13 = arith.mulf %10, %10 : vector<16x1xf32>
    %14 = arith.subf %12, %13 : vector<16x1xf32>
    %cst_8 = arith.constant 0.000000e+00 : f32
    %15 = vector.broadcast %cst_8 : f32 to vector<16x1xf32>
    %16 = arith.maximumf %14, %15 : vector<16x1xf32>
    %cst_9 = arith.constant 9.99999974E-6 : f32
    %17 = vector.broadcast %cst_9 : f32 to vector<16x1xf32>
    %18 = arith.addf %16, %17 : vector<16x1xf32>
    %19 = math.rsqrt %18 : vector<16x1xf32>
    %c0_10 = arith.constant 0 : index
    %c0_11 = arith.constant 0 : index
    %c0_12 = arith.constant 0 : index
    %20 = vector.load %arg3[%c0_10, %c0_11, %c0_12] : memref<4x1x32xf32, #tpu.memory_space<vmem>>, vector<4x1x32xf32>
    %c0_13 = arith.constant 0 : index
    %c0_14 = arith.constant 0 : index
    %c0_15 = arith.constant 0 : index
    %21 = vector.load %arg4[%c0_13, %c0_14, %c0_15] : memref<4x1x32xf32, #tpu.memory_space<vmem>>, vector<4x1x32xf32>
    %22 = vector.shape_cast %10 : vector<16x1xf32> to vector<1x16x1xf32>
    %23 = vector.broadcast %22 : vector<1x16x1xf32> to vector<4x16x32xf32>
    %24 = arith.subf %1, %23 : vector<4x16x32xf32>
    %25 = vector.shape_cast %19 : vector<16x1xf32> to vector<1x16x1xf32>
    %26 = vector.broadcast %25 : vector<1x16x1xf32> to vector<4x16x32xf32>
    %27 = arith.mulf %24, %26 : vector<4x16x32xf32>
    %28 = vector.broadcast %20 : vector<4x1x32xf32> to vector<4x16x32xf32>
    %29 = arith.mulf %27, %28 : vector<4x16x32xf32>
    %30 = vector.broadcast %21 : vector<4x1x32xf32> to vector<4x16x32xf32>
    %31 = arith.addf %29, %30 : vector<4x16x32xf32>
    %c0_16 = arith.constant 0 : index
    %c0_17 = arith.constant 0 : index
    %c0_18 = arith.constant 0 : index
    %c0_19 = arith.constant 0 : index
    %32 = vector.load %arg5[%c0_16, %c0_17, %c0_18, %c0_19] : memref<1x4x16x32xf32, #tpu.memory_space<vmem>>, vector<1x4x16x32xf32>
    %33 = vector.shape_cast %32 : vector<1x4x16x32xf32> to vector<4x16x32xf32>
    %34 = vector.shape_cast %31 : vector<4x16x32xf32> to vector<1x4x16x32xf32>
    tpu.vector_store %arg5[%c0_16, %c0_17, %c0_18, %c0_19], %34 {strides = array<i32>} : memref<1x4x16x32xf32, #tpu.memory_space<vmem>>, vector<1x4x16x32xf32>,
    return
  }
  func.func @transform_0(%arg0: i32, %arg1: i32) -> (i32, i32, i32, i32) {
    %c0_i32 = arith.constant 0 : i32
    %c0_i32_0 = arith.constant 0 : i32
    %c0_i32_1 = arith.constant 0 : i32
    return %arg0, %c0_i32, %arg1, %c0_i32_0 : i32, i32, i32, i32
  }
  func.func @transform_1(%arg0: i32, %arg1: i32) -> (i32, i32, i32) {
    %c0_i32 = arith.constant 0 : i32
    %c0_i32_0 = arith.constant 0 : i32
    %c0_i32_1 = arith.constant 0 : i32
    %c0_i32_2 = arith.constant 0 : i32
    return %c0_i32, %c0_i32_0, %c0_i32_1 : i32, i32, i32
  }
  func.func @transform_2(%arg0: i32, %arg1: i32) -> (i32, i32, i32) {
    %c0_i32 = arith.constant 0 : i32
    %c0_i32_0 = arith.constant 0 : i32
    %c0_i32_1 = arith.constant 0 : i32
    %c0_i32_2 = arith.constant 0 : i32
    return %c0_i32, %c0_i32_0, %c0_i32_1 : i32, i32, i32
  }
  func.func @transform_3(%arg0: i32, %arg1: i32) -> (i32, i32, i32, i32) {
    %c0_i32 = arith.constant 0 : i32
    %c0_i32_0 = arith.constant 0 : i32
    %c0_i32_1 = arith.constant 0 : i32
    return %arg0, %c0_i32, %arg1, %c0_i32_0 : i32, i32, i32, i32
  }
}

</mosaic_0001>

<bundles_post_ra>
// kernel: tpu_custom_call.1
= control target key start
LH: loop header
LB: loop body
LE: loop exit
PB: predicated region body
PF: predicated region fallthrough
CT: control target
= control target key end

     0   :  { %8 = vsyncpa [#allocation3], 0  ;;  %s1100_s0 = inlined_call_operand.hbm [shape: f32[2,4,16,32], index: 0, kind: input, shape index: {}]   ;;  %s1101_s1 = inlined_call_operand.hbm [shape: f32[4,1,32], index: 1, kind: input, shape index: {}]   ;;  %s1102_s2 = inlined_call_operand.vmem [shape: f32[4,1,32], index: 2, kind: input, shape index: {}]   ;;  %s1103_s3 = inlined_call_operand.hbm [shape: f32[2,4,16,32], index: 3, kind: output, shape index: {}]  }
   0x1   :  { %10 = vsyncpa [#allocation3 + $0x1], 0 }
   0x2   :  { %11 = vsyncpa [#allocation6], 0 }
   0x3   :  { %12 = vsyncpa [#allocation4], 0 }
   0x4   :  { %14 = vsyncpa [#allocation4 + $0x1], 0  ;;  %s789_s12 = smov 0   ;;  %s791_s13 = smov 0  }
   0x5   :  { %s793_s14 = smov 0   ;;  %s795_s15 = smov 0  }
   0x6   :  { %s797_s16 = smov 0   ;;  %s799_s17 = smov 0  }
   0x7 LB: > { %s504_s18 = sadd.s32 4294967295, %s758_s17   ;;  %s505_s19 = sadd.s32 4294967294, %s758_s17   ;;  %s758_s17 = sphi %s799_s17, %s20_s17   ;;  %s754_s16 = sphi %s797_s16, %s1127_s16   ;;  %s750_s15 = sphi %s795_s15, %s1126_s15   ;;  %s746_s14 = sphi %s793_s14, %s1125_s14   ;;  %s742_s13 = sphi %s791_s13, %s1124_s13   ;;  %s738_s12 = sphi %s789_s12, %s1123_s12  }
   0x8   : > { %p54_p0 = scmp.ne.s32.totalorder %s742_s13, %s738_s12  ;;  %p823_p1 = scmp.eq.s32.totalorder %s504_s18, 0 }
   0x9   : > { %p827_p2 = scmp.eq.s32.totalorder %s504_s18, 1  ;;  %p128_p3 = scmp.eq.s32.totalorder %s505_s19, 1 }
   0xa   : > { %s1108_s20 = scalar_select %p823_p1, 1, 0 }
   0xb   : > { %s1109_s21 = scalar_select %p827_p2, 1, 0 }
   0xc   : > { %p833_p4 = por %p823_p1, %p54_p0  ;;  %p506_p5 = scmp.ge.s32.totalorder %s758_s17, 1 }
   0xd   : > { %p838_p6 = por %p128_p3, %p54_p0  ;;  %p135_p7 = scmp.lt.s32.totalorder %s758_s17, 3 }
   0xe   : > { %s1110_s22 = scalar_select %p833_p4, 1, 0 }
   0xf   : > { %s1111_s23 = scalar_select %p838_p6, 1, 0 }
  0x10   : > { %p843_p8 = pnand %p506_p5, %p135_p7  ;;  %s760_s25 = smov [#allocation5]  }
  0x11   : > { %s147_s26 = sshll.u32 %s760_s25, 4  ;;  %s32_s28 = sadd.s32 1, %s754_s16  ;;  %s148_s26 = int_to_ptr.vmem [resolvable:$true] %s147_s26 }
  0x12   : > { %s1112_s24 = scalar_select %p843_p8, 1, 0 }
  0x13   : > { %p539_p9 = pneg %p843_p8  ;;  %s614_s4 = scalar_lea.hbm %s1101_s1, 64 }
  0x14   : > { %p615_p12 = scmp.ne.s32.totalorder %s1101_s1, %s614_s4  ;;  %p621_p5 = scmp.lt.u32.totalorder %s614_s4, %s1101_s1 }
  0x15   : > { %p852_p11 = pnand %p539_p9, %p823_p1 }
  0x17   : > { %p616_p13 = pneg %p852_p11 }
  0x19   : > { %p617_p0 = pnand %p616_p13, %p615_p12 }
  0x1b   : > { %p618_p3 = pneg %p617_p0 }
  0x1d   : > { %p623_p7 = pnand %p621_p5, %p618_p3 }
  0x1f   : > { %626 = shalt.err (!%p623_p7)
}
  0x20   : > { %s627_s9 = scalar_lea.vmem %s148_s26, 64  ;;  %p635_p1 = scmp.lt.s32.totalorder %s148_s26, %s148_s26 }
  0x21   : > { %p628_p9 = scmp.ne.s32.totalorder %s148_s26, %s627_s9  ;;  %p636_p4 = scmp.lt.s32.totalorder %s627_s9, %s627_s9 }
  0x23   : > { %p630_p10 = pnand %p628_p9, %p616_p13  ;;  %p637_p8 = por %p636_p4, %p635_p1 }
  0x25   : > { %p631_p6 = pneg %p630_p10 }
  0x27   : > { %p638_p2 = pnand %p637_p8, %p631_p6 }
  0x29   : > { %641 = shalt.err (!%p638_p2)
}
  0x2a   : > { %s761_s10 = smov 16   ;;  %s762_s11 = smov 1  }
  0x2b   : > { %542 = dma.hbm_to_vmem [thread:$0]  (!%p852_p11), %s1101_s1, 64, %s148_s26, [#allocation6], %s761_s10, %s761_s10, %s762_s11  }
  0x2c   : > { %p34_p1 = scmp.ge.s32.totalorder %s32_s28, 2  ;;  %s41_s25 = sadd.s32 1, %s746_s14 }
  0x2d   : > { %p48_p2 = scmp.ne.s32.totalorder %s746_s14, %s742_s13  ;;  %p49_p4 = scmp.eq.s32.totalorder %s758_s17, 0 }
  0x2e   : > { %s1129_s28 = smov (%p34_p1, %s32_s28), 0  ;;  %p1115_p8 = scmp.ne.s32.totalorder %s1109_s21, 0 }
  0x2f   : > { %p879_p6 = por %p49_p4, %p48_p2  ;;  %s36_s27 = ssub.s32 %s754_s16, %s1129_s28 }
  0x30   : > { %p885_p10 = por %p1115_p8, %p48_p2  ;;  %p552_p12 = scmp.lt.s32.totalorder %s758_s17, 2 }
  0x31   : > { %p39_p11 = scmp.eq.s32.totalorder %s36_s27, 0  ;;  %s164_s26 = sand.u32 1, %s746_s14  }
  0x32   : > { %s509_s4 = sshll.u32 %s164_s26, 6  ;;  %s529_s6 = sshll.u32 %s754_s16, 10 }
  0x33   : > { %s894_s5 = scalar_select %p39_p11, %s746_s14, %s41_s25  }
  0x34   : > { %s900_s9 = scalar_lea.hbm %s1100_s0, %s529_s6  ;;  %s168_s21 = scalar_lea.vmem [#allocation2], %s509_s4 }
  0x35   : > { %s177_s10 = sshll.u32 %s168_s21, 4  ;;  %p906_p13 = pnand %p552_p12, %p879_p6  ;;  %s902_s10 = int_to_ptr.vmem [resolvable:$true] %s177_s10 }
  0x36   : > { %s910_s18 = scalar_lea.sflag [#allocation3], %s164_s26  ;;  %s642_s19 = scalar_lea.hbm %s900_s9, 1024 }
  0x37   : > { %p643_p0 = scmp.ne.s32.totalorder %s900_s9, %s642_s19  ;;  %p644_p3 = pneg %p906_p13 }
  0x38   : > { %s647_s29 = scalar_lea.hbm %s1100_s0, 2048  ;;  %p648_p9 = scmp.lt.u32.totalorder %s900_s9, %s1100_s0 }
  0x39   : > { %p645_p5 = pnand %p644_p3, %p643_p0  ;;  %p649_p1 = scmp.lt.u32.totalorder %s647_s29, %s642_s19 }
  0x3a   : > { %p651_p4 = scmp.lt.u32.totalorder %s642_s19, %s900_s9 }
  0x3b   : > { %p646_p7 = pneg %p645_p5  ;;  %p650_p2 = por %p649_p1, %p648_p9 }
  0x3d   : > { %p652_p6 = por %p651_p4, %p650_p2 }
  0x3f   : > { %p653_p8 = pnand %p652_p6, %p646_p7 }
  0x41   : > { %656 = shalt.err (!%p653_p8)
}
  0x42   : > { %s657_s26 = scalar_lea.vmem %s902_s10, 1024  ;;  %s763_s7 = smov [#allocation2]  }
  0x43   : > { %p658_p12 = scmp.ne.s32.totalorder %s902_s10, %s657_s26  ;;  %s662_s8 = sshll.u32 %s763_s7, 4  ;;  %s663_s8 = int_to_ptr.vmem [resolvable:$false] %s662_s8 }
  0x44   : > { %s664_s21 = scalar_lea.vmem %s663_s8, 2048  ;;  %p665_p5 = scmp.lt.s32.totalorder %s902_s10, %s663_s8 }
  0x45   : > { %p660_p11 = pnand %p658_p12, %p644_p3  ;;  %p666_p9 = scmp.lt.s32.totalorder %s664_s21, %s657_s26 }
  0x47   : > { %p661_p0 = pneg %p660_p11  ;;  %p667_p1 = por %p666_p9, %p665_p5 }
  0x49   : > { %p668_p2 = pnand %p667_p1, %p661_p0 }
  0x4b   : > { %671 = shalt.err (!%p668_p2)
}
  0x4c   : > { %s764_s19 = smov 128   ;;  %s765_s25 = smov 8  }
  0x4d   : > { %546 = dma.hbm_to_vmem [thread:$0]  (!%p906_p13), %s900_s9, 1024, %s902_s10, %s910_s18, %s764_s19, %s764_s19, %s765_s25  }
  0x4e   : > { %p1118_p3 = scmp.ne.s32.totalorder %s1112_s24, 0 }
  0x4f   : > { %s941_s27 = sand.u32 (!%p1118_p3), 1, %s742_s13   ;;  %p1119_p7 = scmp.ne.s32.totalorder (!%p1118_p3), %s1110_s22, 0 }
  0x50   : > { %189 = sbr.rel (%p1118_p3) target bundleno = 291 (0x123), region = 32  ;;  %s513_s29 = sshll.u32 (!%p1118_p3), %s941_s27, 6 }
  0x51   : > { %s192_s4 = scalar_lea.sflag (!%p1118_p3), [#allocation3], %s941_s27  ;;  %s195_s6 = scalar_lea.vmem (!%p1118_p3), [#allocation2], %s513_s29 }
  0x57   : > { %725 = dma.done.wait (%p1119_p7), %s192_s4, 1024  }
  0x58   : > { %727 = vsyncadd (%p1119_p7), %s192_s4, 4294966272  ;;  %p1120_p13 = scmp.ne.s32.totalorder %s1108_s20, 0 }
  0x5a   : > { %729 = dma.done.wait (%p1120_p13), [#allocation6], 64  }
  0x5b   : > { %731 = vsyncadd (%p1120_p13), [#allocation6], 4294967232  ;;  %vm232_vm0 = vcmask 261120   ;;  %v955_v0 = vld [vmem:[%s195_s6] sm:$0xff]  ;;  %v957_v1 = vld [vmem:[%s195_s6 + $0x10] sm:$0xff]  ;;  %s530_s7 = sshll.u32 %s750_s15, 10 }
  0x5c   : > { %v959_v2 = vld [vmem:[%s195_s6 + $0x20] sm:$0xff]  ;;  %v961_v3 = vld [vmem:[%s195_s6 + $0x30] sm:$0xff]  ;;  %v233_v4 = vsel %vm232_vm0, %v955_v0, 0.0  ;;  %v234_v5 = vsel %vm232_vm0, %v957_v1, 0.0  ;;  %v247_v7 = vmul.f32 %v955_v0, %v955_v0  ;;  %v971_v8 = vld [vmem:[%s195_s6 + $0x8] sm:$0xff]  ;;  %v249_v12 = vmul.f32 %v957_v1, %v957_v1  ;;  %s221_s8 = scalar_lea.vmem [#allocation7], %s513_s29  ;;  %s1045_s15 = scalar_lea.hbm %s1103_s3, %s530_s7 }
  0x5d   : > { %v236_v6 = vsel %vm232_vm0, %v959_v2, 0.0  ;;  %v973_v9 = vld [vmem:[%s195_s6 + $0x18] sm:$0xff]  ;;  %v235_v10 = vadd.f32 %v234_v5, %v233_v4  ;;  %v238_v11 = vsel %vm232_vm0, %v961_v3, 0.0  ;;  %v251_v13 = vmul.f32 %v959_v2, %v959_v2  ;;  %v981_v14 = vld [vmem:[%s195_s6 + $0x28] sm:$0xff]  ;;  %s407_s21 = sshll.u32 %s221_s8, 4  ;;  %s392_s29 = scalar_lea.sflag [#allocation4], %s941_s27  ;;  %s1047_s21 = int_to_ptr.vmem [resolvable:$true] %s407_s21 }
  0x5e   : > { %v983_v15 = vld [vmem:[%s195_s6 + $0x38] sm:$0xff]  ;;  %v253_v16 = vmul.f32 %v961_v3, %v961_v3  ;;  %v255_v17 = vsel %vm232_vm0, %v247_v7, 0.0  ;;  %v240_v18 = vsel %vm232_vm0, %v971_v8, 0.0  ;;  %v241_v19 = vsel %vm232_vm0, %v973_v9, 0.0  ;;  %s672_s4 = scalar_lea.vmem %s1047_s21, 1024  ;;  %s766_s6 = smov [#allocation7]  }
  0x5f   : > { %v237_v20 = vadd.f32 %v236_v6, %v235_v10  ;;  %v256_v21 = vsel %vm232_vm0, %v249_v12, 0.0  ;;  %v258_v22 = vsel %vm232_vm0, %v251_v13, 0.0  ;;  %v242_v23 = vadd.f32 %v241_v19, %v240_v18  ;;  %v516_v10 = vld [vmem:[#allocation5] ss:$0 sm:$0xff]  ;;  %v517_v12 = vld [vmem:[#allocation5 + $0x1] ss:$0 sm:$0xff]  ;;  %p673_p4 = scmp.ne.s32.totalorder %s1047_s21, %s672_s4 }
  0x60   : > { %v257_v24 = vadd.f32 %v256_v21, %v255_v17  ;;  %v260_v25 = vsel %vm232_vm0, %v253_v16, 0.0  ;;  %v243_v26 = vsel %vm232_vm0, %v981_v14, 0.0  ;;  %v245_v27 = vsel %vm232_vm0, %v983_v15, 0.0  ;;  %v518_v13 = vld [vmem:[#allocation5 + $0x2] ss:$0 sm:$0xff]  ;;  %s676_s20 = sshll.u32 %s766_s6, 4  ;;  %s677_s20 = int_to_ptr.vmem [resolvable:$false] %s676_s20 }
  0x61   : > { %v239_v28 = vadd.f32 %v238_v11, %v237_v20  ;;  %v244_v29 = vadd.f32 %v243_v26, %v242_v23  ;;  %v248_v30 = vmul.f32 %v971_v8, %v971_v8  ;;  %v250_v31 = vmul.f32 %v973_v9, %v973_v9  ;;  %v519_v16 = vld [vmem:[#allocation5 + $0x3] ss:$0 sm:$0xff]  ;;  %v520_v17 = vld [vmem:[%s1102_s2] ss:$0 sm:$0xff]  ;;  %p674_p6 = pnand %p673_p4, %p885_p10  ;;  %s678_s22 = scalar_lea.vmem %s677_s20, 2048 }
  0x62   : > { %v259_v32 = vadd.f32 %v258_v22, %v257_v24  ;;  %v252_v33 = vmul.f32 %v981_v14, %v981_v14  ;;  %v254_v34 = vmul.f32 %v983_v15, %v983_v15  ;;  %p679_p12 = scmp.lt.s32.totalorder %s1047_s21, %s677_s20  ;;  %p680_p11 = scmp.lt.s32.totalorder %s678_s22, %s672_s4 }
  0x63   : > { %v269_v35 = vsel %vm232_vm0, %v239_v28, 0.0  ;;  %v246_v36 = vadd.f32 %v245_v27, %v244_v29  ;;  %v262_v37 = vsel %vm232_vm0, %v248_v30, 0.0  ;;  %v263_v38 = vsel %vm232_vm0, %v250_v31, 0.0  ;;  %p675_p8 = pneg %p674_p6 }
  0x64   : > { %270 = vadd.xlane.f32.xlu0 %v269_v35  ;;  %v261_v39 = vadd.f32 %v260_v25, %v259_v32  ;;  %v264_v40 = vadd.f32 %v263_v38, %v262_v37  ;;  %v265_v41 = vsel %vm232_vm0, %v252_v33, 0.0  ;;  %v267_v43 = vsel %vm232_vm0, %v254_v34, 0.0  ;;  %p681_p0 = por %p680_p11, %p679_p12 }
  0x65   : > { %v272_v42 = vsel %vm232_vm0, %v246_v36, 0.0 }
  0x66   : > { %v275_v44 = vsel %vm232_vm0, %v261_v39, 0.0  ;;  %v266_v45 = vadd.f32 %v265_v41, %v264_v40  ;;  %p682_p5 = pnand %p681_p0, %p675_p8 }
  0x67   : > { %276 = vadd.xlane.f32.xlu1 %v275_v44 }
  0x68   : > { %273 = vadd.xlane.f32.xlu0 %v272_v42  ;;  %v268_v46 = vadd.f32 %v267_v43, %v266_v45 }
  0x6a   : > { %v278_v47 = vsel %vm232_vm0, %v268_v46, 0.0 }
  0x6b   : > { %279 = vadd.xlane.f32.xlu1 %v278_v47 }
  0xf1   : > { %v271_v48 = vpop.xlane.xlu0 %270 }
  0xf2   : > { %v281_v49 = vmul.f32 0.0078125, %v271_v48 }
  0xf4   : > { %v277_v50 = vpop.xlane.xlu1 %276  ;;  %v285_v52 = vmul.f32 %v281_v49, %v281_v49  ;;  %v303_v4 = vsub.f32 %v955_v0, %v281_v49  ;;  %v305_v5 = vsub.f32 %v957_v1, %v281_v49  ;;  %v307_v6 = vsub.f32 %v959_v2, %v281_v49  ;;  %v521_v0 = vld [vmem:[%s1102_s2 + $0x1] ss:$0 sm:$0xff]  ;;  %v522_v1 = vld [vmem:[%s1102_s2 + $0x2] ss:$0 sm:$0xff]  ;;  %v523_v2 = vld [vmem:[%s1102_s2 + $0x3] ss:$0 sm:$0xff] }
  0xf5   : > { %v283_v51 = vmul.f32 0.0078125, %v277_v50  ;;  %v274_v53 = vpop.xlane.xlu0 %273  ;;  %v309_v7 = vsub.f32 %v961_v3, %v281_v49 }
  0xf6   : > { %v282_v54 = vmul.f32 0.0078125, %v274_v53 }
  0xf7   : > { %v287_v55 = vsub.f32 %v283_v51, %v285_v52 }
  0xf8   : > { %v280_v56 = vpop.xlane.xlu1 %279  ;;  %v286_v59 = vmul.f32 %v282_v54, %v282_v54  ;;  %v304_v26 = vsub.f32 %v971_v8, %v282_v54  ;;  %v306_v27 = vsub.f32 %v973_v9, %v282_v54  ;;  %v308_v28 = vsub.f32 %v981_v14, %v282_v54 }
  0xf9   : > { %v289_v57 = vmax.f32 %v287_v55, 0.0  ;;  %v284_v58 = vmul.f32 0.0078125, %v280_v56  ;;  %v310_v29 = vsub.f32 %v983_v15, %v282_v54 }
  0xfb   : > { %v291_v60 = vadd.f32 1e-05, %v289_v57  ;;  %v288_v61 = vsub.f32 %v284_v58, %v286_v59 }
  0xfd   : > { %610 = vrsqrt.f32 %v291_v60  ;;  %v290_v62 = vmax.f32 %v288_v61, 0.0 }
  0xff   : > { %v292_v63 = vadd.f32 1e-05, %v290_v62 }
 0x101   : > { %612 = vrsqrt.f32 %v292_v63 }
 0x107   : > { %v611_v11 = vpop.eup %610 }
 0x108   : > { %v311_v18 = vmul.f32 %v611_v11, %v303_v4  ;;  %v313_v19 = vmul.f32 %v611_v11, %v305_v5  ;;  %v315_v20 = vmul.f32 %v611_v11, %v307_v6  ;;  %v317_v21 = vmul.f32 %v611_v11, %v309_v7 }
 0x10a   : > { %v343_v3 = vmul.f32 %v516_v10, %v311_v18  ;;  %v345_v22 = vmul.f32 %v517_v12, %v313_v19  ;;  %v347_v23 = vmul.f32 %v518_v13, %v315_v20  ;;  %v349_v24 = vmul.f32 %v519_v16, %v317_v21 }
 0x10b   : > { %v613_v25 = vpop.eup %612 }
 0x10c   : > { %v375_v30 = vadd.f32 %v520_v17, %v343_v3  ;;  %v377_v31 = vadd.f32 %v521_v0, %v345_v22  ;;  %v379_v32 = vadd.f32 %v522_v1, %v347_v23  ;;  %v381_v33 = vadd.f32 %v523_v2, %v349_v24 }
 0x10d   : > { %v312_v34 = vmul.f32 %v613_v25, %v304_v26  ;;  %v314_v35 = vmul.f32 %v613_v25, %v306_v27  ;;  %v316_v36 = vmul.f32 %v613_v25, %v308_v28  ;;  %v318_v37 = vmul.f32 %v613_v25, %v310_v29 }
 0x10e   : > { %383 = vst.msk [vmem:[%s221_s8] sm:$0xff] %vm232_vm0, %v375_v30  ;;  %385 = vst.msk [vmem:[%s221_s8 + $0x10] sm:$0xff] %vm232_vm0, %v377_v31 }
 0x10f   : > { %387 = vst.msk [vmem:[%s221_s8 + $0x20] sm:$0xff] %vm232_vm0, %v379_v32  ;;  %389 = vst.msk [vmem:[%s221_s8 + $0x30] sm:$0xff] %vm232_vm0, %v381_v33  ;;  %v344_v8 = vmul.f32 %v516_v10, %v312_v34  ;;  %v346_v9 = vmul.f32 %v517_v12, %v314_v35  ;;  %v348_v14 = vmul.f32 %v518_v13, %v316_v36 }
 0x110   : > { %v350_v15 = vmul.f32 %v519_v16, %v318_v37 }
 0x111   : > { %v376_v38 = vadd.f32 %v520_v17, %v344_v8  ;;  %v378_v39 = vadd.f32 %v521_v0, %v346_v9  ;;  %v380_v40 = vadd.f32 %v522_v1, %v348_v14 }
 0x112   : > { %v382_v41 = vadd.f32 %v523_v2, %v350_v15 }
 0x113   : > { %384 = vst.msk [vmem:[%s221_s8 + $0x8] sm:$0xff] %vm232_vm0, %v376_v38  ;;  %386 = vst.msk [vmem:[%s221_s8 + $0x18] sm:$0xff] %vm232_vm0, %v378_v39 }
 0x114   : > { %388 = vst.msk [vmem:[%s221_s8 + $0x28] sm:$0xff] %vm232_vm0, %v380_v40  ;;  %390 = vst.msk [vmem:[%s221_s8 + $0x38] sm:$0xff] %vm232_vm0, %v382_v41 }
 0x115   : > { %685 = shalt.err (!%p682_p5)
}
 0x116   : > { %s686_s24 = scalar_lea.hbm %s1045_s15, 1024  ;;  %s690_s11 = scalar_lea.hbm %s1103_s3, 2048 }
 0x117   : > { %p687_p9 = scmp.ne.s32.totalorder %s1045_s15, %s686_s24  ;;  %p691_p3 = scmp.lt.u32.totalorder %s1045_s15, %s1103_s3 }
 0x118   : > { %p692_p7 = scmp.lt.u32.totalorder %s690_s11, %s686_s24  ;;  %p694_p4 = scmp.lt.u32.totalorder %s686_s24, %s1045_s15 }
 0x119   : > { %p688_p1 = pnand %p687_p9, %p885_p10 }
 0x11a   : > { %p693_p13 = por %p692_p7, %p691_p3 }
 0x11b   : > { %p689_p2 = pneg %p688_p1 }
 0x11c   : > { %p695_p6 = por %p694_p4, %p693_p13 }
 0x11e   : > { %p696_p8 = pnand %p695_p6, %p689_p2 }
 0x120   : > { %699 = shalt.err (!%p696_p8)
}
 0x121   : > { %s767_s7 = smov 128   ;;  %s768_s8 = smov 8  }
 0x122   : > { %537 = dma.vmem_to_hbm [thread:$0]  (%p885_p10), %s1047_s21, 1024, %s1045_s15, %s392_s29, %s767_s7, %s767_s7, %s768_s8  }
 0x123 PF: > { %s422_s19 = sand.u32 1, %s738_s12   ;;  %p1121_p12 = scmp.ne.s32.totalorder %s1111_s23, 0 }
 0x124   : > { %p1122_p11 = scmp.ge.s32.totalorder %s758_s17, 2  ;;  %s423_s25 = scalar_lea.sflag [#allocation4], %s422_s19 }
 0x126   : > { %p548_p0 = pnand %p1122_p11, %p1121_p12 }
 0x128   : > { %733 = dma.done.wait (!%p548_p0), %s423_s25, 1024  }
 0x129   : > { %735 = vsyncadd (!%p548_p0), %s423_s25, 4294966272  ;;  %s20_s17 = sadd.s32 1, %s758_s17   ;;  %s1123_s12 = smov %s742_s13 }
 0x12a   : > { %p17_p5 = scmp.ge.s32.totalorder %s20_s17, 4   ;;  %s1124_s13 = smov %s746_s14 }
 0x12b   : > { %s1125_s14 = smov %s894_s5  ;;  %s1126_s15 = smov %s754_s16 }
 0x12c   : > { %s1127_s16 = smov %s1129_s28  ;;  %19 = sbr.rel (!%p17_p5) target bundleno = 7 (0x7), region = 81 }
 0x133   :  { %428 = vsyncpa [#allocation3], 1 }
 0x134   :  { %430 = vsyncpa [#allocation3 + $0x1], 1 }
 0x135   :  { %431 = vsyncpa [#allocation6], 1 }
 0x136   :  { %432 = vsyncpa [#allocation4], 1 }
 0x137   :  { %434 = vsyncpa [#allocation4 + $0x1], 1 }

</bundles_post_ra>
